<compile_context>
chip_gen: v7x
topology: tpu7x:2x2x1
jax: 0.10.0
libtpu: 0.0.40
codegen_flags: <defaults>
</compile_context>

<pallas_src>
import jax
import jax.numpy as jnp
import numpy as np
from jax.experimental import pallas as pl
from jax.experimental.pallas import tpu as pltpu


def _round_up(v, m):
    return ((v + m - 1) // m) * m


def _resident_spec(block_shape, index_map):
    """Grid-constant operand: ask for a single resident buffer (no double-buffering)."""
    try:
        return pl.BlockSpec(block_shape, index_map, pipeline_mode=pl.Buffered(1))
    except (TypeError, AttributeError):
        return pl.BlockSpec(block_shape, index_map)


def _pick_tiling(T2, F2, C, B):
    """Pick the time-tile size and VMEM limit from the chip's VMEM capacity."""
    try:
        cap = int(pltpu.get_tpu_info().vmem_capacity_bytes)
    except Exception:
        cap = 64 * 1024 * 1024  # v7x-safe default
    budget = int(cap * 0.6)

    def footprint(tt2):
        r = tt2 * F2
        xim = 2 * 9 * r * 9 * 2                      # double-buffered bf16 patch block
        out = 2 * r * C * 4                          # double-buffered f32 output block
        wts = 9 * C * C * 2 + 9 * C * 2 + 2 * C * 4  # single-buffered resident weights
        h = 9 * r * C * 2                            # conv1 activation scratch (bf16)
        acc = r * C * 4                              # conv2 accumulator value
        return xim + out + wts + h + acc

    max_tt2 = max(8, _round_up(T2, 8))
    tt2 = 8
    for cand in (256, 128, 64, 32, 16):
        if cand <= max_tt2 and footprint(cand) <= budget:
            tt2 = cand
            break
    # v7x has 2 TensorCores: keep at least 2 grid steps when the data allows it.
    if B * pl.cdiv(T2, tt2) < 2 and T2 > 8:
        tt2 = max(8, _round_up(pl.cdiv(T2, 2), 8))
    vmem_limit = int(min(cap * 0.9, 128 * 1024 * 1024))
    return tt2, vmem_limit


def _conv_subsample_kernel(xim_ref, w1_ref, b1_ref, w2_ref, b2_ref, out_ref, h_ref):
    """Fused conv1(1->C)+ReLU -> conv2(C->C)+ReLU for one (batch, time-tile) grid step.

    xim : (1, 9, R, 9) bf16  conv1 3x3 patches, grouped by the conv2 tap g=(kh,kw) that
                             consumes them; rows ordered (t2_local, f2), R = tt2*F2.
    w1  : (9, C)  bf16       conv1 weights (taps x channels).
    b1  : (1, C)  f32
    w2  : (9, C, C) bf16     conv2 weights per tap g=(kh,kw).
    b2  : (1, C)  f32
    out : (1, R, C) f32      rows (t2_local, f2), channels on lanes (lane-dense store).
    h   : (9, R, C) bf16     VMEM scratch holding the conv1 activations per tap group.
    """
    w1 = w1_ref[...]
    b1 = b1_ref[...]

    # conv1: nine tiny (R, 9) @ (9, C) im2col GEMMs, all sharing the same resident RHS.
    for g in range(9):
        hg = jnp.dot(xim_ref[0, g, :, :], w1, preferred_element_type=jnp.float32)
        h_ref[g] = jnp.maximum(hg + b1, 0.0).astype(h_ref.dtype)

    # conv2: nine accumulated (R, C) @ (C, C) GEMMs (large M), clean accumulate chain.
    acc = jnp.dot(h_ref[0], w2_ref[0], preferred_element_type=jnp.float32)
    for g in range(1, 9):
        acc = acc + jnp.dot(h_ref[g], w2_ref[g], preferred_element_type=jnp.float32)

    out_ref[0] = jnp.maximum(acc + b2_ref[...], 0.0).astype(out_ref.dtype)


def prepare_params(params):
    """One-time (per-model) weight reformatting; keep it out of the per-call jit path."""
    w1, b1, w2, b2 = params                      # HWIO: w1 (3,3,1,C), w2 (3,3,C,C)
    C = w1.shape[-1]
    w1c = w1[:, :, 0, :].reshape(9, C).astype(jnp.bfloat16)   # tap (kh*3+kw) x channel
    w2r = w2.reshape(9, C, C).astype(jnp.bfloat16)            # tap (kh*3+kw) x Cin x Cout
    b1r = b1.reshape(1, C).astype(jnp.float32)
    b2r = b2.reshape(1, C).astype(jnp.float32)
    return w1c, b1r, w2r, b2r


def conv_subsample(x, prepared):
    """x: (B, T, F) float32 -> (B, T2, C*F2), matching ConvSubsample.forward."""
    w1c, b1r, w2r, b2r = prepared
    B, T, F = x.shape
    C = w1c.shape[-1]
    T1 = (T - 3) // 2 + 1
    F1 = (F - 3) // 2 + 1
    T2 = (T1 - 3) // 2 + 1
    F2 = (F1 - 3) // 2 + 1
    assert T2 >= 1 and F2 >= 1, "input too small for two stride-2 3x3 valid convs"

    tt2, vmem_limit = _pick_tiling(T2, F2, C, B)
    n_t2 = pl.cdiv(T2, tt2)
    T2p = n_t2 * tt2
    R = tt2 * F2                                  # conv2 GEMM M per grid step

    # ---- conv1 patch gather (1 input channel -> tiny), grouped by conv2 tap ----------
    # xim[b, kh*3+kw, t2*F2 + j, dkh*3+dkw] = x[b, 4*t2 + 2*kh + dkh, 4*j + 2*kw + dkw]
    t_need = 4 * T2p + 8
    f_need = 4 * F2 + 8
    xpad = jnp.pad(x.astype(jnp.float32),
                   ((0, 0), (0, max(0, t_need - T)), (0, max(0, f_need - F))))
    groups = []
    for kh in range(3):
        for kw in range(3):
            taps = []
            for dkh in range(3):
                for dkw in range(3):
                    et, ef = 2 * kh + dkh, 2 * kw + dkw
                    sl = xpad[:, et::4, ef::4][:, :T2p, :F2]     # (B, T2p, F2)
                    taps.append(sl)
            g = jnp.stack(taps, axis=-1)                         # (B, T2p, F2, 9)
            groups.append(g.reshape(B, T2p * F2, 9))
    xim = jnp.stack(groups, axis=1).astype(jnp.bfloat16)         # (B, 9, T2p*F2, 9)

    out_k = pl.pallas_call(
        _conv_subsample_kernel,
        out_shape=jax.ShapeDtypeStruct((B, T2p * F2, C), jnp.float32),
        grid=(B, n_t2),
        in_specs=[
            pl.BlockSpec((1, 9, R, 9), lambda b, i: (b, 0, i, 0)),     # patches, tile i
            _resident_spec((9, C), lambda b, i: (0, 0)),               # w1 (resident)
            _resident_spec((1, C), lambda b, i: (0, 0)),               # b1
            _resident_spec((9, C, C), lambda b, i: (0, 0, 0)),         # w2 (resident)
            _resident_spec((1, C), lambda b, i: (0, 0)),               # b2
        ],
        out_specs=pl.BlockSpec((1, R, C), lambda b, i: (b, i, 0)),
        scratch_shapes=[pltpu.VMEM((9, R, C), jnp.bfloat16)],
        compiler_params=pltpu.CompilerParams(
            dimension_semantics=("parallel", "parallel"),
            vmem_limit_bytes=vmem_limit,
        ),
    )(xim, w1c, b1r, w2r, b2r)

    out = out_k.reshape(B, T2p, F2, C)[:, :T2]
    # TODO(synk): fold this (f2, c) -> (c, f2) channel interleave into the kernel
    # epilogue (XLU minor-dim transpose) once value reshapes across the unaligned F2
    # minor dim lower robustly; for now one small XLA transpose handles it.
    return jnp.transpose(out, (0, 1, 3, 2)).reshape(B, T2, C * F2)


def init_params(key, out_channels):
    """Deterministic synthetic parameters (shapes from nn.Conv2d in __init__), HWIO."""
    k1, k2, k3, k4 = jax.random.split(key, 4)
    w1 = 0.1 * jax.random.normal(k1, (3, 3, 1, out_channels), jnp.float32)
    b1 = 0.1 * jax.random.normal(k2, (out_channels,), jnp.float32)
    w2 = 0.1 * jax.random.normal(k3, (3, 3, out_channels, out_channels), jnp.float32)
    b2 = 0.1 * jax.random.normal(k4, (out_channels,), jnp.float32)
    return w1, b1, w2, b2


def _reference(x, params):
    """Pure-JAX reference (lax.conv) replicating the PyTorch module semantics."""
    w1, b1, w2, b2 = params
    dn = ("NHWC", "HWIO", "NHWC")
    h = x[:, :, :, None]
    h = jax.lax.conv_general_dilated(h, w1, (2, 2), "VALID", dimension_numbers=dn,
                                     precision=jax.lax.Precision.HIGHEST)
    h = jnp.maximum(h + b1, 0.0)
    h = jax.lax.conv_general_dilated(h, w2, (2, 2), "VALID", dimension_numbers=dn,
                                     precision=jax.lax.Precision.HIGHEST)
    h = jnp.maximum(h + b2, 0.0)
    B, T2, F2, C = h.shape
    return jnp.transpose(h, (0, 1, 3, 2)).reshape(B, T2, C * F2)


if __name__ == "__main__":
    out_channels = 8
    B, T, F = 2, 16, 16

    key = jax.random.PRNGKey(0)
    kx, kp = jax.random.split(key)
    x = jax.random.normal(kx, (B, T, F), jnp.float32)
    params = init_params(kp, out_channels)
    prepared = prepare_params(params)            # once per model, outside the jit path

    fwd = jax.jit(conv_subsample)
    out = jax.block_until_ready(fwd(x, prepared))
    ref = jax.block_until_ready(_reference(x, params))

    T1, F1 = (T - 3) // 2 + 1, (F - 3) // 2 + 1
    T2, F2 = (T1 - 3) // 2 + 1, (F1 - 3) // 2 + 1
    assert out.shape == (B, T2, out_channels * F2), out.shape
    # MXU operands are bf16 (single-pass), the reference is Precision.HIGHEST f32, so a
    # few bf16 ULPs of difference are expected.
    np.testing.assert_allclose(np.asarray(out), np.asarray(ref), rtol=1e-2, atol=1e-2)

    print("KERNEL_OK")
</pallas_src>

<mosaic_0001>
module attributes {stable_mosaic.version = 11 : i64} {
  func.func @_conv_subsample_kernel(%arg0: i32, %arg1: i32, %arg2: memref<1x9x24x9xbf16, #tpu.memory_space<vmem>>, %arg3: memref<9x8xbf16, #tpu.memory_space<vmem>>, %arg4: memref<1x8xf32, #tpu.memory_space<vmem>>, %arg5: memref<9x8x8xbf16, #tpu.memory_space<vmem>>, %arg6: memref<1x8xf32, #tpu.memory_space<vmem>>, %arg7: memref<1x24x8xf32, #tpu.memory_space<vmem>>, %arg8: memref<9x24x8xbf16, #tpu.memory_space<vmem>>) attributes {dimension_semantics = [#tpu.dimension_semantics<parallel>, #tpu.dimension_semantics<parallel>], iteration_bounds = array<i64: 2, 1>, scalar_prefetch = 0 : i64, scratch_operands = 1 : i64, tpu.core_type = #tpu.core_type<tc>, window_params = [{transform_indices = @transform_0, window_bounds = array<i64: 1, 9, 24, 9>}, {pipeline_mode = #tpu.pipeline_mode<synchronous>, transform_indices = @transform_1, window_bounds = array<i64: 9, 8>}, {pipeline_mode = #tpu.pipeline_mode<synchronous>, transform_indices = @transform_2, window_bounds = array<i64: 1, 8>}, {pipeline_mode = #tpu.pipeline_mode<synchronous>, transform_indices = @transform_3, window_bounds = array<i64: 9, 8, 8>}, {pipeline_mode = #tpu.pipeline_mode<synchronous>, transform_indices = @transform_4, window_bounds = array<i64: 1, 8>}, {transform_indices = @transform_5, window_bounds = array<i64: 1, 24, 8>}]} {
    %c0 = arith.constant 0 : index
    %c0_0 = arith.constant 0 : index
    %0 = vector.load %arg3[%c0, %c0_0] : memref<9x8xbf16, #tpu.memory_space<vmem>>, vector<9x8xbf16>
    %c0_1 = arith.constant 0 : index
    %c0_2 = arith.constant 0 : index
    %1 = vector.load %arg4[%c0_1, %c0_2] : memref<1x8xf32, #tpu.memory_space<vmem>>, vector<1x8xf32>
    %c0_3 = arith.constant 0 : index
    %c0_4 = arith.constant 0 : index
    %c0_5 = arith.constant 0 : index
    %c0_6 = arith.constant 0 : index
    %2 = vector.load %arg2[%c0_3, %c0_4, %c0_5, %c0_6] : memref<1x9x24x9xbf16, #tpu.memory_space<vmem>>, vector<1x1x24x9xbf16>
    %3 = vector.shape_cast %2 : vector<1x1x24x9xbf16> to vector<24x9xbf16>
    %cst = arith.constant dense<0.000000e+00> : vector<24x8xf32>
    %4 = tpu.matmul %3, %0, %cst {dimension_numbers = #tpu.dot_dimension_numbers<[1], [0], [0], [1], [0, 0, 1, 1], [], []>} : vector<24x9xbf16>, vector<9x8xbf16>, vector<24x8xf32> -> vector<24x8xf32>
    %5 = vector.broadcast %1 : vector<1x8xf32> to vector<24x8xf32>
    %6 = arith.addf %4, %5 : vector<24x8xf32>
    %cst_7 = arith.constant 0.000000e+00 : f32
    %7 = vector.broadcast %cst_7 : f32 to vector<24x8xf32>
    %8 = arith.maximumf %6, %7 : vector<24x8xf32>
    %9 = arith.truncf %8 : vector<24x8xf32> to vector<24x8xbf16>
    %c0_8 = arith.constant 0 : index
    %c0_9 = arith.constant 0 : index
    %c0_10 = arith.constant 0 : index
    %10 = vector.load %arg8[%c0_8, %c0_9, %c0_10] : memref<9x24x8xbf16, #tpu.memory_space<vmem>>, vector<1x24x8xbf16>
    %11 = vector.shape_cast %10 : vector<1x24x8xbf16> to vector<24x8xbf16>
    %12 = vector.shape_cast %9 : vector<24x8xbf16> to vector<1x24x8xbf16>
    tpu.vector_store %arg8[%c0_8, %c0_9, %c0_10], %12 {strides = array<i32>} : memref<9x24x8xbf16, #tpu.memory_space<vmem>>, vector<1x24x8xbf16>,
    %c0_11 = arith.constant 0 : index
    %c1 = arith.constant 1 : index
    %c0_12 = arith.constant 0 : index
    %c0_13 = arith.constant 0 : index
    %13 = vector.load %arg2[%c0_11, %c1, %c0_12, %c0_13] : memref<1x9x24x9xbf16, #tpu.memory_space<vmem>>, vector<1x1x24x9xbf16>
    %14 = vector.shape_cast %13 : vector<1x1x24x9xbf16> to vector<24x9xbf16>
    %cst_14 = arith.constant dense<0.000000e+00> : vector<24x8xf32>
    %15 = tpu.matmul %14, %0, %cst_14 {dimension_numbers = #tpu.dot_dimension_numbers<[1], [0], [0], [1], [0, 0, 1, 1], [], []>} : vector<24x9xbf16>, vector<9x8xbf16>, vector<24x8xf32> -> vector<24x8xf32>
    %16 = vector.broadcast %1 : vector<1x8xf32> to vector<24x8xf32>
    %17 = arith.addf %15, %16 : vector<24x8xf32>
    %cst_15 = arith.constant 0.000000e+00 : f32
    %18 = vector.broadcast %cst_15 : f32 to vector<24x8xf32>
    %19 = arith.maximumf %17, %18 : vector<24x8xf32>
    %20 = arith.truncf %19 : vector<24x8xf32> to vector<24x8xbf16>
    %c1_16 = arith.constant 1 : index
    %c0_17 = arith.constant 0 : index
    %c0_18 = arith.constant 0 : index
    %21 = vector.load %arg8[%c1_16, %c0_17, %c0_18] : memref<9x24x8xbf16, #tpu.memory_space<vmem>>, vector<1x24x8xbf16>
    %22 = vector.shape_cast %21 : vector<1x24x8xbf16> to vector<24x8xbf16>
    %23 = vector.shape_cast %20 : vector<24x8xbf16> to vector<1x24x8xbf16>
    tpu.vector_store %arg8[%c1_16, %c0_17, %c0_18], %23 {strides = array<i32>} : memref<9x24x8xbf16, #tpu.memory_space<vmem>>, vector<1x24x8xbf16>,
    %c0_19 = arith.constant 0 : index
    %c2 = arith.constant 2 : index
    %c0_20 = arith.constant 0 : index
    %c0_21 = arith.constant 0 : index
    %24 = vector.load %arg2[%c0_19, %c2, %c0_20, %c0_21] : memref<1x9x24x9xbf16, #tpu.memory_space<vmem>>, vector<1x1x24x9xbf16>
    %25 = vector.shape_cast %24 : vector<1x1x24x9xbf16> to vector<24x9xbf16>
    %cst_22 = arith.constant dense<0.000000e+00> : vector<24x8xf32>
    %26 = tpu.matmul %25, %0, %cst_22 {dimension_numbers = #tpu.dot_dimension_numbers<[1], [0], [0], [1], [0, 0, 1, 1], [], []>} : vector<24x9xbf16>, vector<9x8xbf16>, vector<24x8xf32> -> vector<24x8xf32>
    %27 = vector.broadcast %1 : vector<1x8xf32> to vector<24x8xf32>
    %28 = arith.addf %26, %27 : vector<24x8xf32>
    %cst_23 = arith.constant 0.000000e+00 : f32
    %29 = vector.broadcast %cst_23 : f32 to vector<24x8xf32>
    %30 = arith.maximumf %28, %29 : vector<24x8xf32>
    %31 = arith.truncf %30 : vector<24x8xf32> to vector<24x8xbf16>
    %c2_24 = arith.constant 2 : index
    %c0_25 = arith.constant 0 : index
    %c0_26 = arith.constant 0 : index
    %32 = vector.load %arg8[%c2_24, %c0_25, %c0_26] : memref<9x24x8xbf16, #tpu.memory_space<vmem>>, vector<1x24x8xbf16>
    %33 = vector.shape_cast %32 : vector<1x24x8xbf16> to vector<24x8xbf16>
    %34 = vector.shape_cast %31 : vector<24x8xbf16> to vector<1x24x8xbf16>
    tpu.vector_store %arg8[%c2_24, %c0_25, %c0_26], %34 {strides = array<i32>} : memref<9x24x8xbf16, #tpu.memory_space<vmem>>, vector<1x24x8xbf16>,
    %c0_27 = arith.constant 0 : index
    %c3 = arith.constant 3 : index
    %c0_28 = arith.constant 0 : index
    %c0_29 = arith.constant 0 : index
    %35 = vector.load %arg2[%c0_27, %c3, %c0_28, %c0_29] : memref<1x9x24x9xbf16, #tpu.memory_space<vmem>>, vector<1x1x24x9xbf16>
    %36 = vector.shape_cast %35 : vector<1x1x24x9xbf16> to vector<24x9xbf16>
    %cst_30 = arith.constant dense<0.000000e+00> : vector<24x8xf32>
    %37 = tpu.matmul %36, %0, %cst_30 {dimension_numbers = #tpu.dot_dimension_numbers<[1], [0], [0], [1], [0, 0, 1, 1], [], []>} : vector<24x9xbf16>, vector<9x8xbf16>, vector<24x8xf32> -> vector<24x8xf32>
    %38 = vector.broadcast %1 : vector<1x8xf32> to vector<24x8xf32>
    %39 = arith.addf %37, %38 : vector<24x8xf32>
    %cst_31 = arith.constant 0.000000e+00 : f32
    %40 = vector.broadcast %cst_31 : f32 to vector<24x8xf32>
    %41 = arith.maximumf %39, %40 : vector<24x8xf32>
    %42 = arith.truncf %41 : vector<24x8xf32> to vector<24x8xbf16>
    %c3_32 = arith.constant 3 : index
    %c0_33 = arith.constant 0 : index
    %c0_34 = arith.constant 0 : index
    %43 = vector.load %arg8[%c3_32, %c0_33, %c0_34] : memref<9x24x8xbf16, #tpu.memory_space<vmem>>, vector<1x24x8xbf16>
    %44 = vector.shape_cast %43 : vector<1x24x8xbf16> to vector<24x8xbf16>
    %45 = vector.shape_cast %42 : vector<24x8xbf16> to vector<1x24x8xbf16>
    tpu.vector_store %arg8[%c3_32, %c0_33, %c0_34], %45 {strides = array<i32>} : memref<9x24x8xbf16, #tpu.memory_space<vmem>>, vector<1x24x8xbf16>,
    %c0_35 = arith.constant 0 : index
    %c4 = arith.constant 4 : index
    %c0_36 = arith.constant 0 : index
    %c0_37 = arith.constant 0 : index
    %46 = vector.load %arg2[%c0_35, %c4, %c0_36, %c0_37] : memref<1x9x24x9xbf16, #tpu.memory_space<vmem>>, vector<1x1x24x9xbf16>
    %47 = vector.shape_cast %46 : vector<1x1x24x9xbf16> to vector<24x9xbf16>
    %cst_38 = arith.constant dense<0.000000e+00> : vector<24x8xf32>
    %48 = tpu.matmul %47, %0, %cst_38 {dimension_numbers = #tpu.dot_dimension_numbers<[1], [0], [0], [1], [0, 0, 1, 1], [], []>} : vector<24x9xbf16>, vector<9x8xbf16>, vector<24x8xf32> -> vector<24x8xf32>
    %49 = vector.broadcast %1 : vector<1x8xf32> to vector<24x8xf32>
    %50 = arith.addf %48, %49 : vector<24x8xf32>
    %cst_39 = arith.constant 0.000000e+00 : f32
    %51 = vector.broadcast %cst_39 : f32 to vector<24x8xf32>
    %52 = arith.maximumf %50, %51 : vector<24x8xf32>
    %53 = arith.truncf %52 : vector<24x8xf32> to vector<24x8xbf16>
    %c4_40 = arith.constant 4 : index
    %c0_41 = arith.constant 0 : index
    %c0_42 = arith.constant 0 : index
    %54 = vector.load %arg8[%c4_40, %c0_41, %c0_42] : memref<9x24x8xbf16, #tpu.memory_space<vmem>>, vector<1x24x8xbf16>
    %55 = vector.shape_cast %54 : vector<1x24x8xbf16> to vector<24x8xbf16>
    %56 = vector.shape_cast %53 : vector<24x8xbf16> to vector<1x24x8xbf16>
    tpu.vector_store %arg8[%c4_40, %c0_41, %c0_42], %56 {strides = array<i32>} : memref<9x24x8xbf16, #tpu.memory_space<vmem>>, vector<1x24x8xbf16>,
    %c0_43 = arith.constant 0 : index
    %c5 = arith.constant 5 : index
    %c0_44 = arith.constant 0 : index
    %c0_45 = arith.constant 0 : index
    %57 = vector.load %arg2[%c0_43, %c5, %c0_44, %c0_45] : memref<1x9x24x9xbf16, #tpu.memory_space<vmem>>, vector<1x1x24x9xbf16>
    %58 = vector.shape_cast %57 : vector<1x1x24x9xbf16> to vector<24x9xbf16>
    %cst_46 = arith.constant dense<0.000000e+00> : vector<24x8xf32>
    %59 = tpu.matmul %58, %0, %cst_46 {dimension_numbers = #tpu.dot_dimension_numbers<[1], [0], [0], [1], [0, 0, 1, 1], [], []>} : vector<24x9xbf16>, vector<9x8xbf16>, vector<24x8xf32> -> vector<24x8xf32>
    %60 = vector.broadcast %1 : vector<1x8xf32> to vector<24x8xf32>
    %61 = arith.addf %59, %60 : vector<24x8xf32>
    %cst_47 = arith.constant 0.000000e+00 : f32
    %62 = vector.broadcast %cst_47 : f32 to vector<24x8xf32>
    %63 = arith.maximumf %61, %62 : vector<24x8xf32>
    %64 = arith.truncf %63 : vector<24x8xf32> to vector<24x8xbf16>
    %c5_48 = arith.constant 5 : index
    %c0_49 = arith.constant 0 : index
    %c0_50 = arith.constant 0 : index
    %65 = vector.load %arg8[%c5_48, %c0_49, %c0_50] : memref<9x24x8xbf16, #tpu.memory_space<vmem>>, vector<1x24x8xbf16>
    %66 = vector.shape_cast %65 : vector<1x24x8xbf16> to vector<24x8xbf16>
    %67 = vector.shape_cast %64 : vector<24x8xbf16> to vector<1x24x8xbf16>
    tpu.vector_store %arg8[%c5_48, %c0_49, %c0_50], %67 {strides = array<i32>} : memref<9x24x8xbf16, #tpu.memory_space<vmem>>, vector<1x24x8xbf16>,
    %c0_51 = arith.constant 0 : index
    %c6 = arith.constant 6 : index
    %c0_52 = arith.constant 0 : index
    %c0_53 = arith.constant 0 : index
    %68 = vector.load %arg2[%c0_51, %c6, %c0_52, %c0_53] : memref<1x9x24x9xbf16, #tpu.memory_space<vmem>>, vector<1x1x24x9xbf16>
    %69 = vector.shape_cast %68 : vector<1x1x24x9xbf16> to vector<24x9xbf16>
    %cst_54 = arith.constant dense<0.000000e+00> : vector<24x8xf32>
    %70 = tpu.matmul %69, %0, %cst_54 {dimension_numbers = #tpu.dot_dimension_numbers<[1], [0], [0], [1], [0, 0, 1, 1], [], []>} : vector<24x9xbf16>, vector<9x8xbf16>, vector<24x8xf32> -> vector<24x8xf32>
    %71 = vector.broadcast %1 : vector<1x8xf32> to vector<24x8xf32>
    %72 = arith.addf %70, %71 : vector<24x8xf32>
    %cst_55 = arith.constant 0.000000e+00 : f32
    %73 = vector.broadcast %cst_55 : f32 to vector<24x8xf32>
    %74 = arith.maximumf %72, %73 : vector<24x8xf32>
    %75 = arith.truncf %74 : vector<24x8xf32> to vector<24x8xbf16>
    %c6_56 = arith.constant 6 : index
    %c0_57 = arith.constant 0 : index
    %c0_58 = arith.constant 0 : index
    %76 = vector.load %arg8[%c6_56, %c0_57, %c0_58] : memref<9x24x8xbf16, #tpu.memory_space<vmem>>, vector<1x24x8xbf16>
    %77 = vector.shape_cast %76 : vector<1x24x8xbf16> to vector<24x8xbf16>
    %78 = vector.shape_cast %75 : vector<24x8xbf16> to vector<1x24x8xbf16>
    tpu.vector_store %arg8[%c6_56, %c0_57, %c0_58], %78 {strides = array<i32>} : memref<9x24x8xbf16, #tpu.memory_space<vmem>>, vector<1x24x8xbf16>,
    %c0_59 = arith.constant 0 : index
    %c7 = arith.constant 7 : index
    %c0_60 = arith.constant 0 : index
    %c0_61 = arith.constant 0 : index
    %79 = vector.load %arg2[%c0_59, %c7, %c0_60, %c0_61] : memref<1x9x24x9xbf16, #tpu.memory_space<vmem>>, vector<1x1x24x9xbf16>
    %80 = vector.shape_cast %79 : vector<1x1x24x9xbf16> to vector<24x9xbf16>
    %cst_62 = arith.constant dense<0.000000e+00> : vector<24x8xf32>
    %81 = tpu.matmul %80, %0, %cst_62 {dimension_numbers = #tpu.dot_dimension_numbers<[1], [0], [0], [1], [0, 0, 1, 1], [], []>} : vector<24x9xbf16>, vector<9x8xbf16>, vector<24x8xf32> -> vector<24x8xf32>
    %82 = vector.broadcast %1 : vector<1x8xf32> to vector<24x8xf32>
    %83 = arith.addf %81, %82 : vector<24x8xf32>
    %cst_63 = arith.constant 0.000000e+00 : f32
    %84 = vector.broadcast %cst_63 : f32 to vector<24x8xf32>
    %85 = arith.maximumf %83, %84 : vector<24x8xf32>
    %86 = arith.truncf %85 : vector<24x8xf32> to vector<24x8xbf16>
    %c7_64 = arith.constant 7 : index
    %c0_65 = arith.constant 0 : index
    %c0_66 = arith.constant 0 : index
    %87 = vector.load %arg8[%c7_64, %c0_65, %c0_66] : memref<9x24x8xbf16, #tpu.memory_space<vmem>>, vector<1x24x8xbf16>
    %88 = vector.shape_cast %87 : vector<1x24x8xbf16> to vector<24x8xbf16>
    %89 = vector.shape_cast %86 : vector<24x8xbf16> to vector<1x24x8xbf16>
    tpu.vector_store %arg8[%c7_64, %c0_65, %c0_66], %89 {strides = array<i32>} : memref<9x24x8xbf16, #tpu.memory_space<vmem>>, vector<1x24x8xbf16>,
    %c0_67 = arith.constant 0 : index
    %c8 = arith.constant 8 : index
    %c0_68 = arith.constant 0 : index
    %c0_69 = arith.constant 0 : index
    %90 = vector.load %arg2[%c0_67, %c8, %c0_68, %c0_69] : memref<1x9x24x9xbf16, #tpu.memory_space<vmem>>, vector<1x1x24x9xbf16>
    %91 = vector.shape_cast %90 : vector<1x1x24x9xbf16> to vector<24x9xbf16>
    %cst_70 = arith.constant dense<0.000000e+00> : vector<24x8xf32>
    %92 = tpu.matmul %91, %0, %cst_70 {dimension_numbers = #tpu.dot_dimension_numbers<[1], [0], [0], [1], [0, 0, 1, 1], [], []>} : vector<24x9xbf16>, vector<9x8xbf16>, vector<24x8xf32> -> vector<24x8xf32>
    %93 = vector.broadcast %1 : vector<1x8xf32> to vector<24x8xf32>
    %94 = arith.addf %92, %93 : vector<24x8xf32>
    %cst_71 = arith.constant 0.000000e+00 : f32
    %95 = vector.broadcast %cst_71 : f32 to vector<24x8xf32>
    %96 = arith.maximumf %94, %95 : vector<24x8xf32>
    %97 = arith.truncf %96 : vector<24x8xf32> to vector<24x8xbf16>
    %c8_72 = arith.constant 8 : index
    %c0_73 = arith.constant 0 : index
    %c0_74 = arith.constant 0 : index
    %98 = vector.load %arg8[%c8_72, %c0_73, %c0_74] : memref<9x24x8xbf16, #tpu.memory_space<vmem>>, vector<1x24x8xbf16>
    %99 = vector.shape_cast %98 : vector<1x24x8xbf16> to vector<24x8xbf16>
    %100 = vector.shape_cast %97 : vector<24x8xbf16> to vector<1x24x8xbf16>
    tpu.vector_store %arg8[%c8_72, %c0_73, %c0_74], %100 {strides = array<i32>} : memref<9x24x8xbf16, #tpu.memory_space<vmem>>, vector<1x24x8xbf16>,
    %c0_75 = arith.constant 0 : index
    %c0_76 = arith.constant 0 : index
    %c0_77 = arith.constant 0 : index
    %101 = vector.load %arg8[%c0_75, %c0_76, %c0_77] : memref<9x24x8xbf16, #tpu.memory_space<vmem>>, vector<1x24x8xbf16>
    %102 = vector.shape_cast %101 : vector<1x24x8xbf16> to vector<24x8xbf16>
    %c0_78 = arith.constant 0 : index
    %c0_79 = arith.constant 0 : index
    %c0_80 = arith.constant 0 : index
    %103 = vector.load %arg5[%c0_78, %c0_79, %c0_80] : memref<9x8x8xbf16, #tpu.memory_space<vmem>>, vector<1x8x8xbf16>
    %104 = vector.shape_cast %103 : vector<1x8x8xbf16> to vector<8x8xbf16>
    %cst_81 = arith.constant dense<0.000000e+00> : vector<24x8xf32>
    %105 = tpu.matmul %102, %104, %cst_81 {dimension_numbers = #tpu.dot_dimension_numbers<[1], [0], [0], [1], [0, 0, 1, 1], [], []>} : vector<24x8xbf16>, vector<8x8xbf16>, vector<24x8xf32> -> vector<24x8xf32>
    %c1_82 = arith.constant 1 : index
    %c0_83 = arith.constant 0 : index
    %c0_84 = arith.constant 0 : index
    %106 = vector.load %arg8[%c1_82, %c0_83, %c0_84] : memref<9x24x8xbf16, #tpu.memory_space<vmem>>, vector<1x24x8xbf16>
    %107 = vector.shape_cast %106 : vector<1x24x8xbf16> to vector<24x8xbf16>
    %c1_85 = arith.constant 1 : index
    %c0_86 = arith.constant 0 : index
    %c0_87 = arith.constant 0 : index
    %108 = vector.load %arg5[%c1_85, %c0_86, %c0_87] : memref<9x8x8xbf16, #tpu.memory_space<vmem>>, vector<1x8x8xbf16>
    %109 = vector.shape_cast %108 : vector<1x8x8xbf16> to vector<8x8xbf16>
    %cst_88 = arith.constant dense<0.000000e+00> : vector<24x8xf32>
    %110 = tpu.matmul %107, %109, %cst_88 {dimension_numbers = #tpu.dot_dimension_numbers<[1], [0], [0], [1], [0, 0, 1, 1], [], []>} : vector<24x8xbf16>, vector<8x8xbf16>, vector<24x8xf32> -> vector<24x8xf32>
    %111 = arith.addf %105, %110 : vector<24x8xf32>
    %c2_89 = arith.constant 2 : index
    %c0_90 = arith.constant 0 : index
    %c0_91 = arith.constant 0 : index
    %112 = vector.load %arg8[%c2_89, %c0_90, %c0_91] : memref<9x24x8xbf16, #tpu.memory_space<vmem>>, vector<1x24x8xbf16>
    %113 = vector.shape_cast %112 : vector<1x24x8xbf16> to vector<24x8xbf16>
    %c2_92 = arith.constant 2 : index
    %c0_93 = arith.constant 0 : index
    %c0_94 = arith.constant 0 : index
    %114 = vector.load %arg5[%c2_92, %c0_93, %c0_94] : memref<9x8x8xbf16, #tpu.memory_space<vmem>>, vector<1x8x8xbf16>
    %115 = vector.shape_cast %114 : vector<1x8x8xbf16> to vector<8x8xbf16>
    %cst_95 = arith.constant dense<0.000000e+00> : vector<24x8xf32>
    %116 = tpu.matmul %113, %115, %cst_95 {dimension_numbers = #tpu.dot_dimension_numbers<[1], [0], [0], [1], [0, 0, 1, 1], [], []>} : vector<24x8xbf16>, vector<8x8xbf16>, vector<24x8xf32> -> vector<24x8xf32>
    %117 = arith.addf %111, %116 : vector<24x8xf32>
    %c3_96 = arith.constant 3 : index
    %c0_97 = arith.constant 0 : index
    %c0_98 = arith.constant 0 : index
    %118 = vector.load %arg8[%c3_96, %c0_97, %c0_98] : memref<9x24x8xbf16, #tpu.memory_space<vmem>>, vector<1x24x8xbf16>
    %119 = vector.shape_cast %118 : vector<1x24x8xbf16> to vector<24x8xbf16>
    %c3_99 = arith.constant 3 : index
    %c0_100 = arith.constant 0 : index
    %c0_101 = arith.constant 0 : index
    %120 = vector.load %arg5[%c3_99, %c0_100, %c0_101] : memref<9x8x8xbf16, #tpu.memory_space<vmem>>, vector<1x8x8xbf16>
    %121 = vector.shape_cast %120 : vector<1x8x8xbf16> to vector<8x8xbf16>
    %cst_102 = arith.constant dense<0.000000e+00> : vector<24x8xf32>
    %122 = tpu.matmul %119, %121, %cst_102 {dimension_numbers = #tpu.dot_dimension_numbers<[1], [0], [0], [1], [0, 0, 1, 1], [], []>} : vector<24x8xbf16>, vector<8x8xbf16>, vector<24x8xf32> -> vector<24x8xf32>
    %123 = arith.addf %117, %122 : vector<24x8xf32>
    %c4_103 = arith.constant 4 : index
    %c0_104 = arith.constant 0 : index
    %c0_105 = arith.constant 0 : index
    %124 = vector.load %arg8[%c4_103, %c0_104, %c0_105] : memref<9x24x8xbf16, #tpu.memory_space<vmem>>, vector<1x24x8xbf16>
    %125 = vector.shape_cast %124 : vector<1x24x8xbf16> to vector<24x8xbf16>
    %c4_106 = arith.constant 4 : index
    %c0_107 = arith.constant 0 : index
    %c0_108 = arith.constant 0 : index
    %126 = vector.load %arg5[%c4_106, %c0_107, %c0_108] : memref<9x8x8xbf16, #tpu.memory_space<vmem>>, vector<1x8x8xbf16>
    %127 = vector.shape_cast %126 : vector<1x8x8xbf16> to vector<8x8xbf16>
    %cst_109 = arith.constant dense<0.000000e+00> : vector<24x8xf32>
    %128 = tpu.matmul %125, %127, %cst_109 {dimension_numbers = #tpu.dot_dimension_numbers<[1], [0], [0], [1], [0, 0, 1, 1], [], []>} : vector<24x8xbf16>, vector<8x8xbf16>, vector<24x8xf32> -> vector<24x8xf32>
    %129 = arith.addf %123, %128 : vector<24x8xf32>
    %c5_110 = arith.constant 5 : index
    %c0_111 = arith.constant 0 : index
    %c0_112 = arith.constant 0 : index
    %130 = vector.load %arg8[%c5_110, %c0_111, %c0_112] : memref<9x24x8xbf16, #tpu.memory_space<vmem>>, vector<1x24x8xbf16>
    %131 = vector.shape_cast %130 : vector<1x24x8xbf16> to vector<24x8xbf16>
    %c5_113 = arith.constant 5 : index
    %c0_114 = arith.constant 0 : index
    %c0_115 = arith.constant 0 : index
    %132 = vector.load %arg5[%c5_113, %c0_114, %c0_115] : memref<9x8x8xbf16, #tpu.memory_space<vmem>>, vector<1x8x8xbf16>
    %133 = vector.shape_cast %132 : vector<1x8x8xbf16> to vector<8x8xbf16>
    %cst_116 = arith.constant dense<0.000000e+00> : vector<24x8xf32>
    %134 = tpu.matmul %131, %133, %cst_116 {dimension_numbers = #tpu.dot_dimension_numbers<[1], [0], [0], [1], [0, 0, 1, 1], [], []>} : vector<24x8xbf16>, vector<8x8xbf16>, vector<24x8xf32> -> vector<24x8xf32>
    %135 = arith.addf %129, %134 : vector<24x8xf32>
    %c6_117 = arith.constant 6 : index
    %c0_118 = arith.constant 0 : index
    %c0_119 = arith.constant 0 : index
    %136 = vector.load %arg8[%c6_117, %c0_118, %c0_119] : memref<9x24x8xbf16, #tpu.memory_space<vmem>>, vector<1x24x8xbf16>
    %137 = vector.shape_cast %136 : vector<1x24x8xbf16> to vector<24x8xbf16>
    %c6_120 = arith.constant 6 : index
    %c0_121 = arith.constant 0 : index
    %c0_122 = arith.constant 0 : index
    %138 = vector.load %arg5[%c6_120, %c0_121, %c0_122] : memref<9x8x8xbf16, #tpu.memory_space<vmem>>, vector<1x8x8xbf16>
    %139 = vector.shape_cast %138 : vector<1x8x8xbf16> to vector<8x8xbf16>
    %cst_123 = arith.constant dense<0.000000e+00> : vector<24x8xf32>
    %140 = tpu.matmul %137, %139, %cst_123 {dimension_numbers = #tpu.dot_dimension_numbers<[1], [0], [0], [1], [0, 0, 1, 1], [], []>} : vector<24x8xbf16>, vector<8x8xbf16>, vector<24x8xf32> -> vector<24x8xf32>
    %141 = arith.addf %135, %140 : vector<24x8xf32>
    %c7_124 = arith.constant 7 : index
    %c0_125 = arith.constant 0 : index
    %c0_126 = arith.constant 0 : index
    %142 = vector.load %arg8[%c7_124, %c0_125, %c0_126] : memref<9x24x8xbf16, #tpu.memory_space<vmem>>, vector<1x24x8xbf16>
    %143 = vector.shape_cast %142 : vector<1x24x8xbf16> to vector<24x8xbf16>
    %c7_127 = arith.constant 7 : index
    %c0_128 = arith.constant 0 : index
    %c0_129 = arith.constant 0 : index
    %144 = vector.load %arg5[%c7_127, %c0_128, %c0_129] : memref<9x8x8xbf16, #tpu.memory_space<vmem>>, vector<1x8x8xbf16>
    %145 = vector.shape_cast %144 : vector<1x8x8xbf16> to vector<8x8xbf16>
    %cst_130 = arith.constant dense<0.000000e+00> : vector<24x8xf32>
    %146 = tpu.matmul %143, %145, %cst_130 {dimension_numbers = #tpu.dot_dimension_numbers<[1], [0], [0], [1], [0, 0, 1, 1], [], []>} : vector<24x8xbf16>, vector<8x8xbf16>, vector<24x8xf32> -> vector<24x8xf32>
    %147 = arith.addf %141, %146 : vector<24x8xf32>
    %c8_131 = arith.constant 8 : index
    %c0_132 = arith.constant 0 : index
    %c0_133 = arith.constant 0 : index
    %148 = vector.load %arg8[%c8_131, %c0_132, %c0_133] : memref<9x24x8xbf16, #tpu.memory_space<vmem>>, vector<1x24x8xbf16>
    %149 = vector.shape_cast %148 : vector<1x24x8xbf16> to vector<24x8xbf16>
    %c8_134 = arith.constant 8 : index
    %c0_135 = arith.constant 0 : index
    %c0_136 = arith.constant 0 : index
    %150 = vector.load %arg5[%c8_134, %c0_135, %c0_136] : memref<9x8x8xbf16, #tpu.memory_space<vmem>>, vector<1x8x8xbf16>
    %151 = vector.shape_cast %150 : vector<1x8x8xbf16> to vector<8x8xbf16>
    %cst_137 = arith.constant dense<0.000000e+00> : vector<24x8xf32>
    %152 = tpu.matmul %149, %151, %cst_137 {dimension_numbers = #tpu.dot_dimension_numbers<[1], [0], [0], [1], [0, 0, 1, 1], [], []>} : vector<24x8xbf16>, vector<8x8xbf16>, vector<24x8xf32> -> vector<24x8xf32>
    %153 = arith.addf %147, %152 : vector<24x8xf32>
    %c0_138 = arith.constant 0 : index
    %c0_139 = arith.constant 0 : index
    %154 = vector.load %arg6[%c0_138, %c0_139] : memref<1x8xf32, #tpu.memory_space<vmem>>, vector<1x8xf32>
    %155 = vector.broadcast %154 : vector<1x8xf32> to vector<24x8xf32>
    %156 = arith.addf %153, %155 : vector<24x8xf32>
    %cst_140 = arith.constant 0.000000e+00 : f32
    %157 = vector.broadcast %cst_140 : f32 to vector<24x8xf32>
    %158 = arith.maximumf %156, %157 : vector<24x8xf32>
    %c0_141 = arith.constant 0 : index
    %c0_142 = arith.constant 0 : index
    %c0_143 = arith.constant 0 : index
    %159 = vector.load %arg7[%c0_141, %c0_142, %c0_143] : memref<1x24x8xf32, #tpu.memory_space<vmem>>, vector<1x24x8xf32>
    %160 = vector.shape_cast %159 : vector<1x24x8xf32> to vector<24x8xf32>
    %161 = vector.shape_cast %158 : vector<24x8xf32> to vector<1x24x8xf32>
    tpu.vector_store %arg7[%c0_141, %c0_142, %c0_143], %161 {strides = array<i32>} : memref<1x24x8xf32, #tpu.memory_space<vmem>>, vector<1x24x8xf32>,
    return
  }
  func.func @transform_0(%arg0: i32, %arg1: i32) -> (i32, i32, i32, i32) {
    %c0_i32 = arith.constant 0 : i32
    %c0_i32_0 = arith.constant 0 : i32
    %c0_i32_1 = arith.constant 0 : i32
    return %arg0, %c0_i32, %arg1, %c0_i32_0 : i32, i32, i32, i32
  }
  func.func @transform_1(%arg0: i32, %arg1: i32) -> (i32, i32) {
    %c0_i32 = arith.constant 0 : i32
    %c0_i32_0 = arith.constant 0 : i32
    %c0_i32_1 = arith.constant 0 : i32
    return %c0_i32, %c0_i32_0 : i32, i32
  }
  func.func @transform_2(%arg0: i32, %arg1: i32) -> (i32, i32) {
    %c0_i32 = arith.constant 0 : i32
    %c0_i32_0 = arith.constant 0 : i32
    %c0_i32_1 = arith.constant 0 : i32
    return %c0_i32, %c0_i32_0 : i32, i32
  }
  func.func @transform_3(%arg0: i32, %arg1: i32) -> (i32, i32, i32) {
    %c0_i32 = arith.constant 0 : i32
    %c0_i32_0 = arith.constant 0 : i32
    %c0_i32_1 = arith.constant 0 : i32
    %c0_i32_2 = arith.constant 0 : i32
    return %c0_i32, %c0_i32_0, %c0_i32_1 : i32, i32, i32
  }
  func.func @transform_4(%arg0: i32, %arg1: i32) -> (i32, i32) {
    %c0_i32 = arith.constant 0 : i32
    %c0_i32_0 = arith.constant 0 : i32
    %c0_i32_1 = arith.constant 0 : i32
    return %c0_i32, %c0_i32_0 : i32, i32
  }
  func.func @transform_5(%arg0: i32, %arg1: i32) -> (i32, i32, i32) {
    %c0_i32 = arith.constant 0 : i32
    %c0_i32_0 = arith.constant 0 : i32
    return %arg0, %arg1, %c0_i32 : i32, i32, i32
  }
}

</mosaic_0001>

<bundles_post_ra>
// kernel: conv_subsample.1
= control target key start
LH: loop header
LB: loop body
LE: loop exit
PB: predicated region body
PF: predicated region fallthrough
CT: control target
= control target key end

     0   :  { %s2274_s18 = smov 0   ;;  %s2276_s19 = smov 0   ;;  %s2493_s0 = inlined_call_operand.vmem [shape: bf16[2,9,24,9], index: 0, kind: input, shape index: {}]   ;;  %s2494_s1 = inlined_call_operand.vmem [shape: bf16[9,8], index: 1, kind: input, shape index: {}]   ;;  %s2495_s2 = inlined_call_operand.vmem [shape: f32[1,8], index: 2, kind: input, shape index: {}]   ;;  %s2496_s3 = inlined_call_operand.vmem [shape: bf16[9,8,8], index: 3, kind: input, shape index: {}]   ;;  %s2497_s4 = inlined_call_operand.vmem [shape: f32[1,8], index: 4, kind: input, shape index: {}]   ;;  %s2498_s5 = inlined_call_operand.vmem [shape: f32[2,24,8], index: 5, kind: output, shape index: {}]  }
   0x1   :  { %s2278_s20 = smov 0  }
   0x2 LB: > { %s27_s21 = sadd.s32 1, %s2237_s19  ;;  %p1818_p0 = scmp.ge.s32.totalorder %s2241_s20, 1  ;;  %s2241_s20 = sphi %s2278_s20, %s15_s20   ;;  %s2237_s19 = sphi %s2276_s19, %s2500_s19   ;;  %s2233_s18 = sphi %s2274_s18, %s2499_s18  }
   0x3   : > { %p29_p1 = scmp.ge.s32.totalorder %s27_s21, 2  ;;  %p208_p2 = scmp.lt.s32.totalorder %s2241_s20, 3 }
   0x5   : > { %s2502_s21 = smov (%p29_p1, %s27_s21), 0  ;;  %p209_p3 = pnand %p1818_p0, %p208_p2 }
   0x6   : > { %v2182_v0 = vld [vmem:[%s2494_s1] sm:$0x1f] (!%p209_p3)   ;;  %vm297_vm0 = vcmask (!%p209_p3), 1043456   ;;  %vm298_vm1 = vcmask (!%p209_p3), 1044480   ;;  %p245_p4 = scmp.lt.s32.totalorder (!%p209_p3), %s2233_s18, 1  ;;  %v2243_v1 = vmov (!%p209_p3), 65535  }
   0x7   : > { %212 = sbr.rel (%p209_p3) target bundleno = 504 (0x1f8), region = 40  ;;  %v299_v2 = vsel (!%p209_p3), %vm297_vm0, 4294967295, %v2243_v1  ;;  %vm290_vm2 = vcmask (!%p209_p3), 72704   ;;  %v1910_v23 = vld [vmem:[%s2496_s3 + $0x4] sm:$0xf] (!%p209_p3)  ;;  %vm368_vm3 = vcmask (!%p209_p3), 60416  }
   0x8   : > { %v300_v3 = vsel (!%p209_p3), %vm298_vm1, %v299_v2, 0  ;;  %v1063_v24 = vld [vmem:[%s2496_s3] sm:$0xf] (!%p209_p3)  ;;  %v1085_v25 = vsel (!%p209_p3), %vm297_vm0, %v1910_v23, 0  ;;  %v2353_v27 = vld [vmem:[%s2496_s3 + $0x8] sm:$0xf] (!%p209_p3) }
   0x9   : > { %v302_v4 = vand.u32 (!%p209_p3), %v2182_v0, %v300_v3  ;;  %v1150_v26 = vsel (!%p209_p3), %vm297_vm0, %v1063_v24, 0  ;;  %v2360_v28 = vld [vmem:[%s2496_s3 + $0xc] sm:$0xf] (!%p209_p3)  ;;  %v2367_v29 = vld [vmem:[%s2495_s2] ss:$0 sm:$0xff] (!%p209_p3)  ;;  %vm1077_vm4 = vcmask (!%p209_p3), 64512  }
   0xb   : > { %2038 = vmatprep.subr.bf16.mxu0 (!%p209_p3), %v302_v4  ;;  %2044 = vmatprep.subr.bf16.mxu1 (!%p209_p3), %v302_v4 }
   0xc   : > { %2039 = vmatpush3.bf16.msra.mxu0 (!%p209_p3), %v302_v4  ;;  %2045 = vmatpush3.bf16.msra.mxu1 (!%p209_p3), %v302_v4 }
   0xd   : > { %2050 = vmatprep.subr.bf16.mxu0 (!%p209_p3), %v302_v4  ;;  %2056 = vmatprep.subr.bf16.mxu1 (!%p209_p3), %v302_v4 }
   0xe   : > { %s2504_s18 = smov (!%p245_p4, %s2233_s18), 1 }
   0xf   : > { %s2155_s24 = smul.u32 108, %s2504_s18 }
  0x11   : > { %s2302_s27 = scalar_lea.vmem %s2493_s0, %s2155_s24 }
  0x12   : > { %v2183_v5 = vld [vmem:[%s2302_s27] sm:$0xff]   ;;  %v2184_v6 = vld [vmem:[%s2302_s27 + $0xc] sm:$0xff]   ;;  %v2185_v7 = vld [vmem:[%s2302_s27 + $0x8] ss:$0 sps:$4 sm:$0xff]  }
  0x13   : > { %2040 = vmatprep.mubr.msk.bf16.mxu0 %vm290_vm2, %v2183_v5  ;;  %2046 = vmatprep.mubr.msk.bf16.mxu1 %vm290_vm2, %v2184_v6  ;;  %v2186_v8 = vld [vmem:[%s2302_s27 + $0x14] ss:$0 sps:$4 sm:$0xff]   ;;  %v2187_v9 = vld [vmem:[%s2302_s27 + $0x18] sm:$0xff]   ;;  %v2188_v10 = vld [vmem:[%s2302_s27 + $0x24] sm:$0xff]  }
  0x14   : > { %2041 = vmatmul.mubr.msk.bf16.vlgmr.msra.gmra.mrb[0].mxu0 %vm290_vm2, %v2185_v7  ;;  %2047 = vmatmul.mubr.msk.bf16.vlgmr.msra.gmra.mrb[0].mxu1 %vm290_vm2, %v2186_v8  ;;  %v2189_v11 = vld [vmem:[%s2302_s27 + $0x20] ss:$0 sps:$4 sm:$0xff]   ;;  %v2190_v12 = vld [vmem:[%s2302_s27 + $0x2c] ss:$0 sps:$4 sm:$0xff]   ;;  %v2191_v13 = vld [vmem:[%s2302_s27 + $0x30] sm:$0xff]  }
  0x15   : > { %2051 = vmatpush3.bf16.msra.mxu0 %v302_v4  ;;  %2057 = vmatpush3.bf16.msra.mxu1 %v302_v4  ;;  %v2192_v14 = vld [vmem:[%s2302_s27 + $0x3c] sm:$0xff]   ;;  %v2193_v15 = vld [vmem:[%s2302_s27 + $0x38] ss:$0 sps:$4 sm:$0xff]   ;;  %v2194_v16 = vld [vmem:[%s2302_s27 + $0x44] ss:$0 sps:$4 sm:$0xff]  }
  0x16   : > { %2052 = vmatprep.mubr.msk.bf16.mxu0 %vm290_vm2, %v2187_v9  ;;  %2058 = vmatprep.mubr.msk.bf16.mxu1 %vm290_vm2, %v2188_v10  ;;  %v2195_v17 = vld [vmem:[%s2302_s27 + $0x48] sm:$0xff]   ;;  %v2196_v18 = vld [vmem:[%s2302_s27 + $0x54] sm:$0xff]   ;;  %v2197_v19 = vld [vmem:[%s2302_s27 + $0x50] ss:$0 sps:$4 sm:$0xff]  }
  0x17   : > { %2062 = vmatprep.subr.bf16.mxu0 %v302_v4  ;;  %2068 = vmatprep.subr.bf16.mxu1 %v302_v4  ;;  %v2198_v20 = vld [vmem:[%s2302_s27 + $0x5c] ss:$0 sps:$4 sm:$0xff]   ;;  %v2199_v21 = vld [vmem:[%s2302_s27 + $0x60] sm:$0xff]   ;;  %v2200_v22 = vld [vmem:[%s2302_s27 + $0x68] ss:$0 sps:$4 sm:$0xff]   ;;  %s2156_s27 = smul.u32 24, %s2504_s18 }
  0x19   : > { %s262_s7 = scalar_lea.vmem %s2498_s5, %s2156_s27 }
  0x1c   : > { %2053 = vmatmul.mubr.msk.bf16.vlgmr.msra.gmra.mrb[4].mxu0 %vm290_vm2, %v2189_v11  ;;  %2059 = vmatmul.mubr.msk.bf16.vlgmr.msra.gmra.mrb[4].mxu1 %vm290_vm2, %v2190_v12 }
  0x1d   : > { %2063 = vmatpush3.bf16.msra.mxu0 %v302_v4  ;;  %2069 = vmatpush3.bf16.msra.mxu1 %v302_v4 }
  0x1e   : > { %2064 = vmatprep.mubr.msk.bf16.mxu0 %vm290_vm2, %v2191_v13  ;;  %2070 = vmatprep.mubr.msk.bf16.mxu1 %vm290_vm2, %v2192_v14 }
  0x1f   : > { %2074 = vmatprep.subr.bf16.mxu0 %v302_v4  ;;  %2080 = vmatprep.subr.bf16.mxu1 %v302_v4 }
  0x24   : > { %2065 = vmatmul.mubr.msk.bf16.vlgmr.msra.gmra.mrb[8].mxu0 %vm290_vm2, %v2193_v15  ;;  %2071 = vmatmul.mubr.msk.bf16.vlgmr.msra.gmra.mrb[8].mxu1 %vm290_vm2, %v2194_v16 }
  0x25   : > { %2075 = vmatpush3.bf16.msra.mxu0 %v302_v4  ;;  %2081 = vmatpush3.bf16.msra.mxu1 %v302_v4 }
  0x26   : > { %2076 = vmatprep.mubr.msk.bf16.mxu0 %vm290_vm2, %v2195_v17  ;;  %2082 = vmatprep.mubr.msk.bf16.mxu1 %vm290_vm2, %v2196_v18 }
  0x27   : > { %2086 = vmatprep.subr.bf16.mxu0 %v302_v4  ;;  %2146 = vmatprep.subr.msk.bf16.mxu1 %vm297_vm0, %v1910_v23 }
  0x2c   : > { %2077 = vmatmul.mubr.msk.bf16.vlgmr.msra.gmra.mrb[12].mxu0 %vm290_vm2, %v2197_v19  ;;  %2083 = vmatmul.mubr.msk.bf16.vlgmr.msra.gmra.mrb[12].mxu1 %vm290_vm2, %v2198_v20 }
  0x2d   : > { %2087 = vmatpush3.bf16.msra.mxu0 %v302_v4  ;;  %2088 = vmatprep.mubr.msk.bf16.mxu0 %vm290_vm2, %v2199_v21 }
  0x2e   : > { %2147 = vmatprep.subr.msk.bf16.mxu0 %vm297_vm0, %v1063_v24  ;;  %2093 = vmatpush3.bf16.msra.mxu1 %v1085_v25  ;;  %v2395_v24 = vld [vmem:[%s2496_s3 + $0x14] sm:$0xf] }
  0x2f   : > { %2148 = vmatprep.subr.msk.bf16.mxu1 %vm297_vm0, %v2353_v27 }
  0x34   : > { %2089 = vmatmul.mubr.msk.bf16.vlgmr.msra.gmra.mrb[16].mxu0 %vm290_vm2, %v2200_v22 }
  0x35   : > { %2099 = vmatpush3.bf16.msra.mxu0 %v1150_v26 }
  0x36   : > { %2149 = vmatprep.subr.msk.bf16.mxu0 %vm297_vm0, %v2360_v28 }
  0xe7   : > { %v2042_v30 = vpop.f32.mrb[0].mxu0  ;;  %v2048_v32 = vpop.f32.mrb[0].mxu1 }
  0xe8   : > { %v347_v31 = vadd.f32 %v2042_v30, %v2367_v29  ;;  %v338_v33 = vpop.f32.mrb[1].mxu0  ;;  %v433_v34 = vadd.f32 %v2048_v32, %v2367_v29  ;;  %v424_v36 = vpop.f32.mrb[1].mxu1 }
  0xe9   : > { %v339_v35 = vadd.f32 %v2367_v29, %v338_v33  ;;  %v2043_v37 = vpop.f32.mrb[2].mxu0  ;;  %v425_v39 = vadd.f32 %v2367_v29, %v424_v36  ;;  %v2049_v40 = vpop.f32.mrb[2].mxu1  ;;  %v1293_v33 = vsel %vm297_vm0, %v2360_v28, 0  ;;  %v1929_v28 = vld [vmem:[%s2496_s3 + $0x10] sm:$0xf] }
  0xea   : > { %v354_v38 = vmax.f32 %v347_v31, 0.0  ;;  %v341_v41 = vpop.f32.mrb[3].mxu0  ;;  %v440_v42 = vmax.f32 %v433_v34, 0.0  ;;  %v427_v45 = vpop.f32.mrb[3].mxu1 }
  0xeb   : > { %v352_v43 = vmax.f32 %v339_v35, 0.0  ;;  %v342_v44 = vadd.f32 %v2367_v29, %v341_v41  ;;  %v438_v47 = vmax.f32 %v425_v39, 0.0  ;;  %v428_v48 = vadd.f32 %v2367_v29, %v427_v45 }
  0xec   : > { %v1959_v46 = vpack.c.bf16 %v354_v38, %v354_v38  ;;  %v1962_v49 = vpack.c.bf16 %v440_v42, %v440_v42  ;;  %v1220_v39 = vsel %vm297_vm0, %v2353_v27, 0 }
  0xed   : > { %v1957_v50 = vpack.c.bf16 %v352_v43, %v352_v43  ;;  %v353_v51 = vmax.f32 %v342_v44, 0.0  ;;  %v1960_v52 = vpack.c.bf16 %v438_v47, %v438_v47  ;;  %v439_v53 = vmax.f32 %v428_v48, 0.0 }
  0xee   : > { %371 = vst.msk [vmem:[#allocation2 + $0x8] sm:$0xf] %vm368_vm3, %v1959_v46  ;;  %457 = vst.msk [vmem:[#allocation2 + $0x14] sm:$0xf] %vm368_vm3, %v1962_v49 }
  0xef   : > { %369 = vst.msk [vmem:[#allocation2] sm:$0xf] %vm368_vm3, %v1957_v50  ;;  %v1958_v54 = vpack.c.bf16 %v353_v51, %v353_v51  ;;  %v2054_v55 = vpop.f32.mrb[4].mxu0  ;;  %455 = vst.msk [vmem:[#allocation2 + $0xc] sm:$0xf] %vm368_vm3, %v1960_v52  ;;  %v1961_v56 = vpack.c.bf16 %v439_v53, %v439_v53  ;;  %v2060_v58 = vpop.f32.mrb[4].mxu1 }
  0xf0   : > { %v519_v57 = vadd.f32 %v2054_v55, %v2367_v29  ;;  %v510_v59 = vpop.f32.mrb[5].mxu0  ;;  %v605_v60 = vadd.f32 %v2060_v58, %v2367_v29  ;;  %v596_v62 = vpop.f32.mrb[5].mxu1 }
  0xf1   : > { %370 = vst.msk [vmem:[#allocation2 + $0x4] sm:$0xf] %vm368_vm3, %v1958_v54  ;;  %v511_v61 = vadd.f32 %v2367_v29, %v510_v59  ;;  %v2055_v63 = vpop.f32.mrb[6].mxu0  ;;  %456 = vst.msk [vmem:[#allocation2 + $0x10] sm:$0xf] %vm368_vm3, %v1961_v56  ;;  %v597_v1 = vadd.f32 %v2367_v29, %v596_v62  ;;  %v2061_v2 = vpop.f32.mrb[6].mxu1 }
  0xf2   : > { %v526_v0 = vmax.f32 %v519_v57, 0.0  ;;  %v513_v3 = vpop.f32.mrb[7].mxu0  ;;  %v612_v4 = vmax.f32 %v605_v60, 0.0  ;;  %v599_v7 = vpop.f32.mrb[7].mxu1 }
  0xf3   : > { %v524_v5 = vmax.f32 %v511_v61, 0.0  ;;  %v514_v6 = vadd.f32 %v2367_v29, %v513_v3  ;;  %v610_v9 = vmax.f32 %v597_v1, 0.0  ;;  %v600_v10 = vadd.f32 %v2367_v29, %v599_v7  ;;  %v1939_v1 = vld [vmem:[%s2496_s3 + $0x18] sm:$0xf] }
  0xf4   : > { %v1965_v8 = vpack.c.bf16 %v526_v0, %v526_v0  ;;  %v1968_v11 = vpack.c.bf16 %v612_v4, %v612_v4  ;;  %v1366_v0 = vsel %vm297_vm0, %v1929_v28, 0  ;;  %v1439_v7 = vsel %vm297_vm0, %v2395_v24, 0 }
  0xf5   : > { %v1963_v12 = vpack.c.bf16 %v524_v5, %v524_v5  ;;  %v525_v13 = vmax.f32 %v514_v6, 0.0  ;;  %v1966_v14 = vpack.c.bf16 %v610_v9, %v610_v9  ;;  %v611_v15 = vmax.f32 %v600_v10, 0.0  ;;  %v2204_v18 = vld [vmem:[#allocation2 + $0x8] ss:$0 sps:$4 sm:$0xff]   ;;  %v2203_v38 = vld [vmem:[#allocation2 + $0x14] ss:$0 sps:$4 sm:$0xff]  }
  0xf6   : > { %543 = vst.msk [vmem:[#allocation2 + $0x20] sm:$0xf] %vm368_vm3, %v1965_v8  ;;  %629 = vst.msk [vmem:[#allocation2 + $0x2c] sm:$0xf] %vm368_vm3, %v1968_v11 }
  0xf7   : > { %541 = vst.msk [vmem:[#allocation2 + $0x18] sm:$0xf] %vm368_vm3, %v1963_v12  ;;  %v1964_v16 = vpack.c.bf16 %v525_v13, %v525_v13  ;;  %v2066_v17 = vpop.f32.mrb[8].mxu0  ;;  %627 = vst.msk [vmem:[#allocation2 + $0x24] sm:$0xf] %vm368_vm3, %v1966_v14  ;;  %v1967_v19 = vpack.c.bf16 %v611_v15, %v611_v15  ;;  %v2072_v21 = vpop.f32.mrb[8].mxu1 }
  0xf8   : > { %v691_v20 = vadd.f32 %v2066_v17, %v2367_v29  ;;  %v682_v22 = vpop.f32.mrb[9].mxu0  ;;  %v2202_v23 = vld [vmem:[#allocation2] sm:$0xff]   ;;  %v777_v25 = vadd.f32 %v2072_v21, %v2367_v29  ;;  %v768_v30 = vpop.f32.mrb[9].mxu1  ;;  %v2201_v32 = vld [vmem:[#allocation2 + $0xc] sm:$0xff]   ;;  %v1944_v12 = vld [vmem:[%s2496_s3 + $0x1c] sm:$0xf] }
  0xf9   : > { %542 = vst.msk [vmem:[#allocation2 + $0x1c] sm:$0xf] %vm368_vm3, %v1964_v16  ;;  %v683_v26 = vadd.f32 %v2367_v29, %v682_v22  ;;  %v2067_v31 = vpop.f32.mrb[10].mxu0  ;;  %628 = vst.msk [vmem:[#allocation2 + $0x28] sm:$0xf] %vm368_vm3, %v1967_v19  ;;  %v769_v35 = vadd.f32 %v2367_v29, %v768_v30  ;;  %v2073_v36 = vpop.f32.mrb[10].mxu1  ;;  %2100 = vmatprep.mubr.msk.bf16.mxu0 %vm1077_vm4, %v2202_v23  ;;  %2094 = vmatprep.mubr.msk.bf16.mxu1 %vm1077_vm4, %v2201_v32 }
  0xfa   : > { %v698_v34 = vmax.f32 %v691_v20, 0.0  ;;  %v685_v37 = vpop.f32.mrb[11].mxu0  ;;  %v784_v40 = vmax.f32 %v777_v25, 0.0  ;;  %v771_v43 = vpop.f32.mrb[11].mxu1  ;;  %2101 = vmatmul.mubr.msk.bf16.vlgmr.msra.gmra.mrb[20].mxu0 %vm1077_vm4, %v2204_v18  ;;  %2095 = vmatmul.mubr.msk.bf16.vlgmr.msra.gmra.mrb[16].mxu1 %vm1077_vm4, %v2203_v38  ;;  %v1585_v38 = vsel %vm297_vm0, %v1944_v12, 0 }
  0xfb   : > { %v696_v41 = vmax.f32 %v683_v26, 0.0  ;;  %v686_v42 = vadd.f32 %v2367_v29, %v685_v37  ;;  %v782_v45 = vmax.f32 %v769_v35, 0.0  ;;  %v772_v46 = vadd.f32 %v2367_v29, %v771_v43  ;;  %2111 = vmatpush3.bf16.msra.mxu0 %v1293_v33  ;;  %2105 = vmatpush3.bf16.msra.mxu1 %v1220_v39 }
  0xfc   : > { %v1971_v44 = vpack.c.bf16 %v698_v34, %v698_v34  ;;  %v1974_v27 = vpack.c.bf16 %v784_v40, %v784_v40  ;;  %2151 = vmatprep.subr.msk.bf16.mxu0 %vm297_vm0, %v2395_v24  ;;  %2150 = vmatprep.subr.msk.bf16.mxu1 %vm297_vm0, %v1929_v28  ;;  %v1512_v37 = vsel %vm297_vm0, %v1939_v1, 0 }
  0xfd   : > { %v1969_v47 = vpack.c.bf16 %v696_v41, %v696_v41  ;;  %v697_v48 = vmax.f32 %v686_v42, 0.0  ;;  %v1972_v49 = vpack.c.bf16 %v782_v45, %v782_v45  ;;  %v783_v50 = vmax.f32 %v772_v46, 0.0  ;;  %v2208_v53 = vld [vmem:[#allocation2 + $0x2c] ss:$0 sps:$4 sm:$0xff]   ;;  %v2207_v6 = vld [vmem:[#allocation2 + $0x20] ss:$0 sps:$4 sm:$0xff]  }
  0xfe   : > { %715 = vst.msk [vmem:[#allocation2 + $0x38] sm:$0xf] %vm368_vm3, %v1971_v44  ;;  %801 = vst.msk [vmem:[#allocation2 + $0x44] sm:$0xf] %vm368_vm3, %v1974_v27  ;;  %v1949_v41 = vld [vmem:[%s2496_s3 + $0x20] sm:$0xf] }
  0xff   : > { %713 = vst.msk [vmem:[#allocation2 + $0x30] sm:$0xf] %vm368_vm3, %v1969_v47  ;;  %v1970_v51 = vpack.c.bf16 %v697_v48, %v697_v48  ;;  %v2078_v52 = vpop.f32.mrb[12].mxu0  ;;  %799 = vst.msk [vmem:[#allocation2 + $0x3c] sm:$0xf] %vm368_vm3, %v1972_v49  ;;  %v1973_v54 = vpack.c.bf16 %v783_v50, %v783_v50  ;;  %v2084_v56 = vpop.f32.mrb[12].mxu1 }
 0x100   : > { %v863_v55 = vadd.f32 %v2078_v52, %v2367_v29  ;;  %v854_v57 = vpop.f32.mrb[13].mxu0  ;;  %v2205_v58 = vld [vmem:[#allocation2 + $0x18] sm:$0xff]   ;;  %v949_v59 = vadd.f32 %v2084_v56, %v2367_v29  ;;  %v940_v61 = vpop.f32.mrb[13].mxu1  ;;  %v2206_v63 = vld [vmem:[#allocation2 + $0x24] sm:$0xff]   ;;  %v1658_v47 = vsel %vm297_vm0, %v1949_v41, 0 }
 0x101   : > { %714 = vst.msk [vmem:[#allocation2 + $0x34] sm:$0xf] %vm368_vm3, %v1970_v51  ;;  %v855_v60 = vadd.f32 %v2367_v29, %v854_v57  ;;  %v2079_v62 = vpop.f32.mrb[14].mxu0  ;;  %800 = vst.msk [vmem:[#allocation2 + $0x40] sm:$0xf] %vm368_vm3, %v1973_v54  ;;  %v941_v3 = vadd.f32 %v2367_v29, %v940_v61  ;;  %v2085_v4 = vpop.f32.mrb[14].mxu1  ;;  %2106 = vmatprep.mubr.msk.bf16.mxu1 %vm1077_vm4, %v2205_v58  ;;  %2112 = vmatprep.mubr.msk.bf16.mxu0 %vm1077_vm4, %v2206_v63 }
 0x102   : > { %v870_v2 = vmax.f32 %v863_v55, 0.0  ;;  %v857_v5 = vpop.f32.mrb[15].mxu0  ;;  %v956_v8 = vmax.f32 %v949_v59, 0.0  ;;  %v943_v11 = vpop.f32.mrb[15].mxu1  ;;  %2107 = vmatmul.mubr.msk.bf16.vlgmr.msra.gmra.mrb[20].mxu1 %vm1077_vm4, %v2207_v6  ;;  %2113 = vmatmul.mubr.msk.bf16.vlgmr.msra.gmra.mrb[24].mxu0 %vm1077_vm4, %v2208_v53 }
 0x103   : > { %v868_v9 = vmax.f32 %v855_v60, 0.0  ;;  %v858_v10 = vadd.f32 %v2367_v29, %v857_v5  ;;  %v954_v14 = vmax.f32 %v941_v3, 0.0  ;;  %v944_v15 = vadd.f32 %v2367_v29, %v943_v11  ;;  %2117 = vmatpush3.bf16.msra.mxu1 %v1366_v0  ;;  %2123 = vmatpush3.bf16.msra.mxu0 %v1439_v7 }
 0x104   : > { %v1977_v13 = vpack.c.bf16 %v870_v2, %v870_v2  ;;  %v1980_v16 = vpack.c.bf16 %v956_v8, %v956_v8  ;;  %2152 = vmatprep.subr.msk.bf16.mxu1 %vm297_vm0, %v1939_v1  ;;  %2153 = vmatprep.subr.msk.bf16.mxu0 %vm297_vm0, %v1944_v12 }
 0x105   : > { %v1975_v17 = vpack.c.bf16 %v868_v9, %v868_v9  ;;  %v869_v18 = vmax.f32 %v858_v10, 0.0  ;;  %v1978_v19 = vpack.c.bf16 %v954_v14, %v954_v14  ;;  %v955_v20 = vmax.f32 %v944_v15, 0.0  ;;  %v2212_v30 = vld [vmem:[#allocation2 + $0x44] ss:$0 sps:$4 sm:$0xff]   ;;  %v2211_v36 = vld [vmem:[#allocation2 + $0x38] ss:$0 sps:$4 sm:$0xff]  }
 0x106   : > { %887 = vst.msk [vmem:[#allocation2 + $0x50] sm:$0xf] %vm368_vm3, %v1977_v13  ;;  %973 = vst.msk [vmem:[#allocation2 + $0x5c] sm:$0xf] %vm368_vm3, %v1980_v16 }
 0x107   : > { %885 = vst.msk [vmem:[#allocation2 + $0x48] sm:$0xf] %vm368_vm3, %v1975_v17  ;;  %v1976_v21 = vpack.c.bf16 %v869_v18, %v869_v18  ;;  %v2090_v22 = vpop.f32.mrb[16].mxu0  ;;  %971 = vst.msk [vmem:[#allocation2 + $0x54] sm:$0xf] %vm368_vm3, %v1978_v19  ;;  %v1979_v23 = vpack.c.bf16 %v955_v20, %v955_v20 }
 0x108   : > { %v1035_v24 = vadd.f32 %v2090_v22, %v2367_v29  ;;  %v1026_v25 = vpop.f32.mrb[17].mxu0  ;;  %v2209_v26 = vld [vmem:[#allocation2 + $0x30] sm:$0xff]   ;;  %v2210_v33 = vld [vmem:[#allocation2 + $0x3c] sm:$0xff]  }
 0x109   : > { %886 = vst.msk [vmem:[#allocation2 + $0x4c] sm:$0xf] %vm368_vm3, %v1976_v21  ;;  %v1027_v31 = vadd.f32 %v2367_v29, %v1026_v25  ;;  %v2091_v32 = vpop.f32.mrb[18].mxu0  ;;  %972 = vst.msk [vmem:[#allocation2 + $0x58] sm:$0xf] %vm368_vm3, %v1979_v23  ;;  %2118 = vmatprep.mubr.msk.bf16.mxu1 %vm1077_vm4, %v2209_v26  ;;  %2124 = vmatprep.mubr.msk.bf16.mxu0 %vm1077_vm4, %v2210_v33 }
 0x10a   : > { %v1042_v34 = vmax.f32 %v1035_v24, 0.0  ;;  %v1029_v35 = vpop.f32.mrb[19].mxu0  ;;  %2119 = vmatmul.mubr.msk.bf16.vlgmr.msra.gmra.mrb[24].mxu1 %vm1077_vm4, %v2211_v36  ;;  %2125 = vmatmul.mubr.msk.bf16.vlgmr.msra.gmra.mrb[28].mxu0 %vm1077_vm4, %v2212_v30 }
 0x10b   : > { %v1040_v39 = vmax.f32 %v1027_v31, 0.0  ;;  %v1030_v40 = vadd.f32 %v2367_v29, %v1029_v35  ;;  %2129 = vmatpush3.bf16.msra.mxu1 %v1512_v37  ;;  %2135 = vmatpush3.bf16.msra.mxu0 %v1585_v38 }
 0x10c   : > { %v1983_v42 = vpack.c.bf16 %v1042_v34, %v1042_v34  ;;  %2154 = vmatprep.subr.msk.bf16.mxu1 %vm297_vm0, %v1949_v41 }
 0x10d   : > { %v1981_v43 = vpack.c.bf16 %v1040_v39, %v1040_v39  ;;  %v1041_v28 = vmax.f32 %v1030_v40, 0.0  ;;  %v2216_v45 = vld [vmem:[#allocation2 + $0x5c] ss:$0 sps:$4 sm:$0xff]   ;;  %v2215_v27 = vld [vmem:[#allocation2 + $0x50] ss:$0 sps:$4 sm:$0xff]  }
 0x10e   : > { %1059 = vst.msk [vmem:[#allocation2 + $0x68] sm:$0xf] %vm368_vm3, %v1983_v42 }
 0x10f   : > { %1057 = vst.msk [vmem:[#allocation2 + $0x60] sm:$0xf] %vm368_vm3, %v1981_v43  ;;  %v1982_v29 = vpack.c.bf16 %v1041_v28, %v1041_v28  ;;  %v1954_v43 = vld [vmem:[%s2497_s4] ss:$0 sm:$0xff] }
 0x110   : > { %v2213_v44 = vld [vmem:[#allocation2 + $0x48] sm:$0xff]   ;;  %v2214_v46 = vld [vmem:[#allocation2 + $0x54] sm:$0xff]  }
 0x111   : > { %1058 = vst.msk [vmem:[#allocation2 + $0x64] sm:$0xf] %vm368_vm3, %v1982_v29  ;;  %2130 = vmatprep.mubr.msk.bf16.mxu1 %vm1077_vm4, %v2213_v44  ;;  %2136 = vmatprep.mubr.msk.bf16.mxu0 %vm1077_vm4, %v2214_v46 }
 0x112   : > { %2131 = vmatmul.mubr.msk.bf16.vlgmr.msra.gmra.mrb[28].mxu1 %vm1077_vm4, %v2215_v27  ;;  %2137 = vmatmul.mubr.msk.bf16.vlgmr.msra.gmra.mrb[32].mxu0 %vm1077_vm4, %v2216_v45 }
 0x113   : > { %2141 = vmatpush3.bf16.msra.mxu1 %v1658_v47 }
 0x115   : > { %v2218_v49 = vld [vmem:[#allocation2 + $0x68] ss:$0 sps:$4 sm:$0xff]  }
 0x118   : > { %v2217_v48 = vld [vmem:[#allocation2 + $0x60] sm:$0xff]  }
 0x119   : > { %2142 = vmatprep.mubr.msk.bf16.mxu1 %vm1077_vm4, %v2217_v48 }
 0x11a   : > { %2143 = vmatmul.mubr.msk.bf16.vlgmr.msra.gmra.mrb[32].mxu1 %vm1077_vm4, %v2218_v49 }
 0x1cd   : > { %v2102_v50 = vpop.f32.mrb[20].mxu0  ;;  %v2096_v51 = vpop.f32.mrb[16].mxu1 }
 0x1ce   : > { %v1186_v52 = vpop.f32.mrb[21].mxu0  ;;  %v1195_v53 = vadd.f32 %v2102_v50, %v2096_v51  ;;  %v1121_v54 = vpop.f32.mrb[17].mxu1 }
 0x1cf   : > { %v2103_v55 = vpop.f32.mrb[22].mxu0  ;;  %v1187_v56 = vadd.f32 %v1186_v52, %v1121_v54  ;;  %v2097_v57 = vpop.f32.mrb[18].mxu1 }
 0x1d0   : > { %v1189_v58 = vpop.f32.mrb[23].mxu0  ;;  %v1124_v59 = vpop.f32.mrb[19].mxu1 }
 0x1d1   : > { %v1190_v60 = vadd.f32 %v1189_v58, %v1124_v59 }
 0x1d5   : > { %v2108_v61 = vpop.f32.mrb[20].mxu1  ;;  %v2114_v62 = vpop.f32.mrb[24].mxu0 }
 0x1d6   : > { %v1272_v63 = vadd.f32 %v2108_v61, %v1195_v53  ;;  %v1256_v0 = vpop.f32.mrb[21].mxu1  ;;  %v1329_v1 = vpop.f32.mrb[25].mxu0 }
 0x1d7   : > { %v1270_v2 = vadd.f32 %v1256_v0, %v1187_v56  ;;  %v2109_v3 = vpop.f32.mrb[22].mxu1  ;;  %v2115_v4 = vpop.f32.mrb[26].mxu0 }
 0x1d8   : > { %v1345_v5 = vadd.f32 %v2114_v62, %v1272_v63  ;;  %v1259_v6 = vpop.f32.mrb[23].mxu1  ;;  %v1332_v7 = vpop.f32.mrb[27].mxu0 }
 0x1d9   : > { %v1343_v8 = vadd.f32 %v1329_v1, %v1270_v2  ;;  %v1271_v9 = vadd.f32 %v1259_v6, %v1190_v60 }
 0x1db   : > { %v1344_v10 = vadd.f32 %v1332_v7, %v1271_v9 }
 0x1dd   : > { %v2120_v11 = vpop.f32.mrb[24].mxu1  ;;  %v2126_v12 = vpop.f32.mrb[28].mxu0 }
 0x1de   : > { %v1418_v13 = vadd.f32 %v2120_v11, %v1345_v5  ;;  %v1402_v14 = vpop.f32.mrb[25].mxu1  ;;  %v1475_v15 = vpop.f32.mrb[29].mxu0 }
 0x1df   : > { %v1416_v16 = vadd.f32 %v1402_v14, %v1343_v8  ;;  %v2121_v17 = vpop.f32.mrb[26].mxu1  ;;  %v2127_v18 = vpop.f32.mrb[30].mxu0 }
 0x1e0   : > { %v1491_v19 = vadd.f32 %v2126_v12, %v1418_v13  ;;  %v1405_v20 = vpop.f32.mrb[27].mxu1  ;;  %v1478_v21 = vpop.f32.mrb[31].mxu0 }
 0x1e1   : > { %v1489_v22 = vadd.f32 %v1475_v15, %v1416_v16  ;;  %v1417_v23 = vadd.f32 %v1405_v20, %v1344_v10 }
 0x1e3   : > { %v1490_v24 = vadd.f32 %v1478_v21, %v1417_v23 }
 0x1e5   : > { %v2132_v25 = vpop.f32.mrb[28].mxu1  ;;  %v2138_v26 = vpop.f32.mrb[32].mxu0 }
 0x1e6   : > { %v1564_v30 = vadd.f32 %v2132_v25, %v1491_v19  ;;  %v1548_v31 = vpop.f32.mrb[29].mxu1  ;;  %v1621_v32 = vpop.f32.mrb[33].mxu0 }
 0x1e7   : > { %v1562_v33 = vadd.f32 %v1548_v31, %v1489_v22  ;;  %v2133_v34 = vpop.f32.mrb[30].mxu1  ;;  %v2139_v35 = vpop.f32.mrb[34].mxu0 }
 0x1e8   : > { %v1637_v36 = vadd.f32 %v2138_v26, %v1564_v30  ;;  %v1551_v37 = vpop.f32.mrb[31].mxu1  ;;  %v1624_v38 = vpop.f32.mrb[35].mxu0 }
 0x1e9   : > { %v1635_v39 = vadd.f32 %v1621_v32, %v1562_v33  ;;  %v1563_v40 = vadd.f32 %v1551_v37, %v1490_v24 }
 0x1eb   : > { %v1636_v41 = vadd.f32 %v1624_v38, %v1563_v40 }
 0x1ed   : > { %v2144_v42 = vpop.f32.mrb[32].mxu1 }
 0x1ee   : > { %v1710_v28 = vadd.f32 %v2144_v42, %v1637_v36  ;;  %v1694_v29 = vpop.f32.mrb[33].mxu1 }
 0x1ef   : > { %v1708_v44 = vadd.f32 %v1694_v29, %v1635_v39  ;;  %v2145_v45 = vpop.f32.mrb[34].mxu1 }
 0x1f0   : > { %v1720_v46 = vadd.f32 %v1954_v43, %v1710_v28  ;;  %v1697_v27 = vpop.f32.mrb[35].mxu1 }
 0x1f1   : > { %v1718_v47 = vadd.f32 %v1954_v43, %v1708_v44  ;;  %v1709_v48 = vadd.f32 %v1697_v27, %v1636_v41 }
 0x1f2   : > { %v1723_v49 = vmax.f32 %v1720_v46, 0.0 }
 0x1f3   : > { %v1721_v50 = vmax.f32 %v1718_v47, 0.0  ;;  %v1719_v51 = vadd.f32 %v1954_v43, %v1709_v48 }
 0x1f4   : > { %1726 = vst.msk [vmem:[%s262_s7 + $0x10] sm:$0xff] %vm1077_vm4, %v1723_v49 }
 0x1f5   : > { %1724 = vst.msk [vmem:[%s262_s7] sm:$0xff] %vm1077_vm4, %v1721_v50  ;;  %v1722_v52 = vmax.f32 %v1719_v51, 0.0 }
 0x1f7   : > { %1725 = vst.msk [vmem:[%s262_s7 + $0x8] sm:$0xff] %vm1077_vm4, %v1722_v52 }
 0x1f8 PF: > { %s15_s20 = sadd.s32 1, %s2241_s20   ;;  %s2499_s18 = smov %s2237_s19 }
 0x1f9   : > { %p12_p5 = scmp.ge.s32.totalorder %s15_s20, 4   ;;  %s2500_s19 = smov %s2502_s21 }
 0x1fb   :  { %14 = sbr.rel (!%p12_p5) target bundleno = 2 (0x2), region = 94 }

</bundles_post_ra>
